<compile_context>
chip_gen: v7x
topology: tpu7x:2x2x1
jax: 0.10.0
libtpu: 0.0.40
codegen_flags: <defaults>
</compile_context>

<pallas_src>
import functools
import math

import jax
import jax.numpy as jnp
from jax.experimental import pallas as pl
from jax.experimental.pallas import tpu as pltpu


def _cdiv(a: int, b: int) -> int:
    return -(-a // b)


def _num_tensorcores() -> int:
    """Best-effort TensorCores-per-chip (2 on v7x, else 1).  Perf hint only."""
    try:
        info = pltpu.get_tpu_info()
    except Exception:
        return 1
    for attr in ("num_cores", "core_count", "tensorcore_count",
                 "num_tensorcores", "cores_per_chip"):
        n = getattr(info, attr, None)
        if isinstance(n, int) and n > 0:
            return min(n, 2)
    return 1


def _pe_kernel(coef_ref, o_ref, *, k: int, tile_rows: int):
    """One (tile_rows, k*d_model) packed tile of the sinusoidal table.

    Packed element (R, c) encodes sequence position R*k + c // d_model and
    feature f = c % d_model.  coef rows (all length k*d_model):
        row 0: inv_freq[f]                 (per-feature frequency)
        row 1: float(c // d_model)         (intra-packed-row position offset)
        row 2: 1.0 if f is even else 0.0   (sin vs cos select)
    angle = float(position) * inv_freq — a single f32 rounding, identical to
    the reference `position * div_term`; sin/cos chosen per column.
    """
    blk = pl.program_id(0)
    r = jax.lax.broadcasted_iota(jnp.int32, (tile_rows, 1), 0) + blk * tile_rows
    pos_base = (r * k).astype(jnp.float32)          # exact int -> f32
    inv_freq = coef_ref[0:1, :]                     # (1, kd)
    offset = coef_ref[1:2, :]                       # (1, kd)
    is_sin = coef_ref[2:3, :]                       # (1, kd)
    angle = (pos_base + offset) * inv_freq          # (tile_rows, kd), exact pos
    o_ref[...] = jnp.where(is_sin > 0.5, jnp.sin(angle), jnp.cos(angle))


def positional_embedding(x: jax.Array, d_model: int) -> jax.Array:
    """Pallas equivalent of PositionalEmbedding(d_model)(x) -> (1, L, d_model) f32."""
    seq_len = x.shape[1]

    # ---- lane-dense packing: output last dim is a multiple of 128 ----
    k = math.lcm(d_model, 128) // d_model           # always <= 128
    kd = k * d_model

    # ---- tiling over packed rows (each packed row holds k positions) ----
    packed_rows = _cdiv(seq_len, k)
    rows_aligned = _cdiv(packed_rows, 8) * 8        # sublane alignment
    bytes_per_row = kd * 4
    # ~6 MiB per output buffer: double-buffered it fits v5e's 16 MiB default
    # scoped VMEM; v6e/v7x (32 MiB default) have plenty of headroom.
    max_rows_by_vmem = max(8, ((6 << 20) // bytes_per_row) // 8 * 8)
    tile_rows = max(8, min(rows_aligned, max_rows_by_vmem))

    # v7x only: split the (parallel) row axis evenly across the 2 TensorCores,
    # and only when there is enough work for the split to pay for itself.
    n_tc = _num_tensorcores()
    if n_tc > 1 and rows_aligned * bytes_per_row > (2 << 20):
        steps = _cdiv(rows_aligned, tile_rows)
        steps = max(n_tc, _cdiv(steps, n_tc) * n_tc)          # even TC split
        tile_rows = min(tile_rows,
                        max(8, _cdiv(_cdiv(rows_aligned, steps), 8) * 8))
    grid_rows = _cdiv(rows_aligned, tile_rows)

    # ---- hoisted per-column coefficients (VMEM-resident across the grid) ----
    # Built with the same jnp ops as the reference so inv_freq is bit-identical.
    half = jnp.exp(jnp.arange(0, d_model, 2, dtype=jnp.float32)
                   * jnp.float32(-(math.log(10000.0) / d_model)))
    inv_freq = jnp.repeat(half, 2)[:d_model]                        # per-feature freq
    a_row = jnp.tile(inv_freq, k)                                   # (kd,)
    off_row = jnp.repeat(jnp.arange(k, dtype=jnp.float32), d_model)  # (kd,)
    sin_row = jnp.tile((jnp.arange(d_model) % 2 == 0).astype(jnp.float32), k)
    coef = jnp.stack([a_row, off_row, sin_row], axis=0)             # (3, kd) f32

    kernel = functools.partial(_pe_kernel, k=k, tile_rows=tile_rows)
    packed = pl.pallas_call(
        kernel,
        out_shape=jax.ShapeDtypeStruct((grid_rows * tile_rows, kd), jnp.float32),
        grid_spec=pltpu.PrefetchScalarGridSpec(
            num_scalar_prefetch=0,
            grid=(grid_rows,),
            in_specs=[pl.BlockSpec((3, kd), lambda r: (0, 0))],
            out_specs=pl.BlockSpec((tile_rows, kd), lambda r: (r, 0)),
        ),
        compiler_params=pltpu.CompilerParams(
            dimension_semantics=("parallel",)),
    )(coef)

    # unpack lane-dense slab -> (L_pad, d_model), drop padding, add batch dim
    pe = packed.reshape(grid_rows * tile_rows * k, d_model)[:seq_len]
    return pe[None]


def _reference(seq_len: int, d_model: int) -> jnp.ndarray:
    """Pure-JAX reference reproducing the PyTorch buffer construction."""
    position = jnp.arange(seq_len, dtype=jnp.float32)[:, None]
    div_term = jnp.exp(jnp.arange(0, d_model, 2, dtype=jnp.float32)
                       * -(math.log(10000.0) / d_model))
    pe = jnp.zeros((seq_len, d_model), jnp.float32)
    pe = pe.at[:, 0::2].set(jnp.sin(position * div_term))
    pe = pe.at[:, 1::2].set(jnp.cos(position * div_term))
    return pe[None]


if __name__ == "__main__":
    key = jax.random.PRNGKey(0)
    batch, seq, d_model = 2, 8, 32
    # the forward only looks at x.shape[1]; values are irrelevant but realistic
    x = jax.random.normal(key, (batch, seq, d_model), dtype=jnp.float32)

    out = jax.block_until_ready(positional_embedding(x, d_model))
    ref = _reference(seq, d_model)
    assert out.shape == (1, seq, d_model), out.shape
    assert out.dtype == jnp.float32
    assert jnp.allclose(out, ref, atol=1e-5, rtol=1e-5), "mismatch vs reference"

    # non-trivial packing (k=2) plus padded rows / trailing slice
    seq2, d2 = 300, 64
    out2 = jax.block_until_ready(positional_embedding(
        jnp.zeros((1, seq2, d2), jnp.float32), d2))
    assert jnp.allclose(out2, _reference(seq2, d2), atol=1e-5, rtol=1e-5)

    # the shape that previously failed (k=1, large angles on low columns)
    seq3, d3 = 200, 256
    out3 = jax.block_until_ready(positional_embedding(
        jnp.zeros((1, seq3, d3), jnp.float32), d3))
    assert jnp.allclose(out3, _reference(seq3, d3), atol=1e-5, rtol=1e-5)

    print("KERNEL_OK")
</pallas_src>

<mosaic_0001>
module attributes {stable_mosaic.version = 11 : i64} {
  func.func @_pe_kernel(%arg0: i32, %arg1: memref<3x128xf32, #tpu.memory_space<vmem>>, %arg2: memref<8x128xf32, #tpu.memory_space<vmem>>) attributes {dimension_semantics = [#tpu.dimension_semantics<parallel>], iteration_bounds = array<i64: 1>, scalar_prefetch = 0 : i64, scratch_operands = 0 : i64, tpu.core_type = #tpu.core_type<tc>, window_params = [{pipeline_mode = #tpu.pipeline_mode<synchronous>, transform_indices = @transform_0, window_bounds = array<i64: 3, 128>}, {transform_indices = @transform_1, window_bounds = array<i64: 8, 128>}]} {
    %0 = tpu.iota {dimensions = array<i32: 0>} : vector<8x1xi32>
    %c8_i32 = arith.constant 8 : i32
    %1 = arith.muli %arg0, %c8_i32 : i32
    %2 = vector.broadcast %1 : i32 to vector<8x1xi32>
    %3 = arith.addi %0, %2 : vector<8x1xi32>
    %c4_i32 = arith.constant 4 : i32
    %4 = vector.broadcast %c4_i32 : i32 to vector<8x1xi32>
    %5 = arith.muli %3, %4 : vector<8x1xi32>
    %6 = arith.sitofp %5 : vector<8x1xi32> to vector<8x1xf32>
    %c0 = arith.constant 0 : index
    %c0_0 = arith.constant 0 : index
    %7 = vector.load %arg1[%c0, %c0_0] : memref<3x128xf32, #tpu.memory_space<vmem>>, vector<1x128xf32>
    %c1 = arith.constant 1 : index
    %c0_1 = arith.constant 0 : index
    %8 = vector.load %arg1[%c1, %c0_1] : memref<3x128xf32, #tpu.memory_space<vmem>>, vector<1x128xf32>
    %c2 = arith.constant 2 : index
    %c0_2 = arith.constant 0 : index
    %9 = vector.load %arg1[%c2, %c0_2] : memref<3x128xf32, #tpu.memory_space<vmem>>, vector<1x128xf32>
    %10 = vector.broadcast %6 : vector<8x1xf32> to vector<8x128xf32>
    %11 = vector.broadcast %8 : vector<1x128xf32> to vector<8x128xf32>
    %12 = arith.addf %10, %11 : vector<8x128xf32>
    %13 = vector.broadcast %7 : vector<1x128xf32> to vector<8x128xf32>
    %14 = arith.mulf %12, %13 : vector<8x128xf32>
    %cst = arith.constant 5.000000e-01 : f32
    %15 = vector.broadcast %cst : f32 to vector<1x128xf32>
    %16 = arith.cmpf ogt, %9, %15 : vector<1x128xf32>
    %17 = math.sin %14 : vector<8x128xf32>
    %18 = math.cos %14 : vector<8x128xf32>
    %19 = vector.shape_cast %16 : vector<1x128xi1> to vector<1x128xi1>
    %20 = vector.broadcast %19 : vector<1x128xi1> to vector<8x128xi1>
    %21 = arith.select %20, %17, %18 : vector<8x128xi1>, vector<8x128xf32>
    %c0_3 = arith.constant 0 : index
    %c0_4 = arith.constant 0 : index
    %22 = vector.load %arg2[%c0_3, %c0_4] : memref<8x128xf32, #tpu.memory_space<vmem>>, vector<8x128xf32>
    tpu.vector_store %arg2[%c0_3, %c0_4], %21 {strides = array<i32>} : memref<8x128xf32, #tpu.memory_space<vmem>>, vector<8x128xf32>,
    return
  }
  func.func @transform_0(%arg0: i32) -> (i32, i32) {
    %c0_i32 = arith.constant 0 : i32
    %c0_i32_0 = arith.constant 0 : i32
    %c0_i32_1 = arith.constant 0 : i32
    return %c0_i32, %c0_i32_0 : i32, i32
  }
  func.func @transform_1(%arg0: i32) -> (i32, i32) {
    %c0_i32 = arith.constant 0 : i32
    %c0_i32_0 = arith.constant 0 : i32
    return %arg0, %c0_i32 : i32, i32
  }
}

</mosaic_0001>

<bundles_post_ra>
// kernel: tpu_custom_call.1
= control target key start
LH: loop header
LB: loop body
LE: loop exit
PB: predicated region body
PF: predicated region fallthrough
CT: control target
= control target key end

     0   :  { %6 = vsyncpa [#allocation3], 0  ;;  %s415_s0 = inlined_call_operand.hbm [shape: f32[3,128], index: 0, kind: input, shape index: {}]   ;;  %s416_s1 = inlined_call_operand.hbm [shape: f32[8,128], index: 1, kind: output, shape index: {}]  }
   0x1   :  { %7 = vsyncpa [#allocation4], 0  ;;  %s347_s6 = smov [#allocation2]   ;;  %s299_s10 = scalar_lea.hbm %s415_s0, 64 }
   0x2   :  { %s14_s7 = sshll.u32 %s347_s6, 4  ;;  %p300_p0 = scmp.ne.s32.totalorder %s415_s0, %s299_s10  ;;  %s15_s7 = int_to_ptr.vmem [resolvable:$true] %s14_s7 }
   0x3   :  { %p303_p1 = scmp.lt.u32.totalorder %s299_s10, %s415_s0 }
   0x5   :  { %p305_p2 = pnand %p303_p1, %p300_p0 }
   0x7   :  { %308 = shalt.err (!%p305_p2)
}
   0x8   :  { %s309_s15 = scalar_lea.vmem %s15_s7, 64  ;;  %p314_p4 = scmp.lt.s32.totalorder %s15_s7, %s15_s7 }
   0x9   :  { %p310_p3 = scmp.ne.s32.totalorder %s15_s7, %s309_s15  ;;  %p315_p5 = scmp.lt.s32.totalorder %s309_s15, %s309_s15 }
   0xb   :  { %p316_p6 = por %p315_p5, %p314_p4 }
   0xd   :  { %p317_p7 = pnand %p316_p6, %p310_p3 }
   0xf   :  { %320 = shalt.err (!%p317_p7)
}
  0x10   :  { %17 = dma.hbm_to_vmem [thread:$0]  %s415_s0, 64, %s15_s7, [#allocation3]  }
  0x11   :  { %343 = dma.done.wait [#allocation3], 64  }
  0x12   :  { %344 = vsyncadd [#allocation3], 4294967232  ;;  %v21_v0 = vlaneseq  ;;  %v273_v4 = vld [vmem:[#allocation2] ss:$0 sm:$0xff]  ;;  %v272_v5 = vld [vmem:[#allocation2 + $0x1] ss:$0 sm:$0xff] }
  0x13   :  { %v348_v19 = vmov 683565275   ;;  %v349_v21 = vmov 2475754826   ;;  %v350_v23 = vmov 2131351028  }
  0x14   :  { %v378_v1 = vshrl.u32 %v21_v0, 7  ;;  %v351_v25 = vmov 2102212464   ;;  %v352_v27 = vmov 920167782   ;;  %s355_s0 = smov [#allocation5]  }
  0x15   :  { %v353_v34 = vmov 1326507024   ;;  %s263_s18 = sshll.u32 %s355_s0, 4  ;;  %s264_s18 = int_to_ptr.vmem [resolvable:$true] %s263_s18 }
  0x16   :  { %v26_v2 = vmul.u32 4, %v378_v1  ;;  %s321_s19 = scalar_lea.vmem %s264_s18, 128  ;;  %p326_p9 = scmp.lt.s32.totalorder %s264_s18, %s264_s18 }
  0x17   :  { %p322_p8 = scmp.ne.s32.totalorder %s264_s18, %s321_s19  ;;  %p327_p10 = scmp.lt.s32.totalorder %s321_s19, %s321_s19 }
  0x18   :  { %v27_v3 = vcvt.s32.f32 %v26_v2 }
  0x19   :  { %p328_p11 = por %p327_p10, %p326_p9 }
  0x1a   :  { %v35_v6 = vadd.f32 %v272_v5, %v27_v3 }
  0x1b   :  { %p329_p12 = pnand %p328_p11, %p322_p8 }
  0x1c   :  { %v381_v7 = vmul.f32 %v273_v4, %v35_v6 }
  0x1e   :  { %v45_v8 = vand.u32 2139095040, %v381_v7  ;;  %v42_v10 = vand.u32 2147483647, %v381_v7  ;;  %vm44_vm7 = vcmp.lt.s32.totalorder %v381_v7, 0 }
  0x20   :  { %v46_v9 = vshrl.u32 %v45_v8, 23  ;;  %v49_v13 = vand.u32 8388607, %v42_v10  ;;  %vm43_vm8 = vcmp.le.f32.partialorder %v42_v10, 0.7853982 }
  0x22   :  { %v274_v11 = vadd.s32 4294967169, %v46_v9  ;;  %v50_v16 = vor.u32 8388608, %v49_v13 }
  0x24   :  { %v52_v12 = vadd.s32 1, %v274_v11  ;;  %v90_v36 = vshll.u32 %v50_v16, 8 }
  0x26   :  { %vm53_vm0 = vcmp.gt.s32.totalorder %v52_v12, 0 }
  0x27   :  { %v54_v14 = vsel %vm53_vm0, %v52_v12, 0  ;;  %vm134_vm0 = vweird.f32 %v381_v7 }
  0x28   :  { %v56_v15 = vand.u32 31, %v54_v14  ;;  %v55_v17 = vshrl.u32 %v54_v14, 5 }
  0x2a   :  { %v57_v18 = vsub.s32 32, %v56_v15  ;;  %v59_v20 = vshll.u32 %v348_v19, %v56_v15  ;;  %v62_v22 = vshll.u32 %v349_v21, %v56_v15  ;;  %v65_v24 = vshll.u32 %v350_v23, %v56_v15 }
  0x2b   :  { %v68_v26 = vshll.u32 %v351_v25, %v56_v15  ;;  %v71_v28 = vshll.u32 %v352_v27, %v56_v15  ;;  %vm74_vm1 = vcmp.lt.s32.totalorder %v55_v17, 1  ;;  %vm77_vm2 = vcmp.lt.s32.totalorder %v55_v17, 4 }
  0x2c   :  { %v58_v29 = vshrl.u32 %v348_v19, %v57_v18  ;;  %v60_v30 = vshrl.u32 %v349_v21, %v57_v18  ;;  %v63_v31 = vshrl.u32 %v350_v23, %v57_v18  ;;  %v66_v32 = vshrl.u32 %v351_v25, %v57_v18 }
  0x2d   :  { %v69_v33 = vshrl.u32 %v352_v27, %v57_v18  ;;  %v72_v35 = vshrl.u32 %v353_v34, %v57_v18  ;;  %vm75_vm3 = vcmp.lt.s32.totalorder %v55_v17, 2  ;;  %vm76_vm4 = vcmp.lt.s32.totalorder %v55_v17, 3 }
  0x2e   :  { %v61_v37 = vor.u32 %v60_v30, %v59_v20  ;;  %v64_v38 = vor.u32 %v63_v31, %v62_v22  ;;  %v67_v39 = vor.u32 %v66_v32, %v65_v24  ;;  %v252_v32 = vsub.s32 0, %v378_v1 }
  0x2f   :  { %v70_v40 = vor.u32 %v69_v33, %v68_v26  ;;  %v73_v41 = vor.u32 %v72_v35, %v71_v28  ;;  %v30_v28 = vld [vmem:[#allocation2 + $0x2] sm:$0x1]  ;;  %v354_v33 = vmov 0  }
  0x30   :  { %v78_v42 = vsel %vm74_vm1, %v58_v29, %v61_v37  ;;  %v79_v43 = vsel %vm77_vm2, %v67_v39, 2102212464  ;;  %v82_v44 = vsel %vm74_vm1, %v61_v37, %v64_v38  ;;  %v86_v45 = vsel %vm74_vm1, %v64_v38, %v67_v39 }
  0x31   :  { %v80_v46 = vsel %vm76_vm4, %v64_v38, %v79_v43  ;;  %v83_v47 = vsel %vm77_vm2, %v70_v40, 920167782  ;;  %v87_v48 = vsel %vm77_vm2, %v73_v41, 1326507024  ;;  %vm41_vm9 = vcmp.gt.f32.partialorder %v30_v28, 0.5 }
  0x32   :  { %v84_v49 = vsel %vm76_vm4, %v67_v39, %v83_v47  ;;  %v88_v50 = vsel %vm76_vm4, %v70_v40, %v87_v48  ;;  %v81_v51 = vsel %vm75_vm3, %v78_v42, %v80_v46  ;;  %v249_v34 = vsel %vm41_vm9, 1, %v354_v33 }
  0x33   :  { %v85_v52 = vsel %vm75_vm3, %v82_v44, %v84_v49  ;;  %v89_v53 = vsel %vm75_vm3, %v86_v45, %v88_v50  ;;  %v97_v58 = vmul.u32 %v90_v36, %v81_v51  ;;  %v253_v10 = vrot.slane %v249_v34, %v252_v32 }
  0x34   :  { %v387_v54 = vmul.u32.u64.low %v90_v36, %v89_v53  ;;  %v388_v55 = vmul.u32.u64.high %v90_v36, %v89_v53, %v387_v54  ;;  %v390_v56 = vmul.u32.u64.low %v90_v36, %v85_v52  ;;  %v391_v57 = vmul.u32.u64.high %v90_v36, %v85_v52, %v390_v56 }
  0x35   :  { %vm254_vm1 = vcmp.eq.s32.totalorder %v253_v10, 1 }
  0x36   :  { %vm99_vm5 = vc.u32 %v388_v55, %v390_v56  ;;  %v100_v59 = vadd.s32 1, %v391_v57  ;;  %v98_v8 = vadd.s32 %v390_v56, %v388_v55 }
  0x38   :  { %v101_v60 = vsel %vm99_vm5, %v100_v59, %v391_v57 }
  0x39   :  { %v102_v61 = vadd.s32 %v101_v60, %v97_v58 }
  0x3b   :  { %v103_v62 = vadd.s32 536870912, %v102_v61 }
  0x3d   :  { %v104_v63 = vshrl.u32 %v103_v62, 30 }
  0x3f   :  { %v105_v0 = vshll.u32 %v104_v63, 30  ;;  %v128_v21 = vsub.s32 4, %v104_v63 }
  0x41   :  { %v106_v2 = vsub.s32 %v102_v61, %v105_v0  ;;  %v129_v24 = vsel %vm44_vm7, %v128_v21, %v104_v63 }
  0x42   :  { %v131_v27 = vsel %vm43_vm8, 0, %v129_v24 }
  0x43   :  { %v108_v3 = vsub.s32 0, %v106_v2  ;;  %v135_v29 = vadd.s32 3, %v131_v27  ;;  %v239_v31 = vand.u32 3, %v131_v27 }
  0x45   :  { %v275_v4 = vmin.u32 %v108_v3, %v106_v2  ;;  %v136_v30 = vand.u32 3, %v135_v29  ;;  %vm244_vm11 = vcmp.eq.s32.totalorder %v239_v31, 2  ;;  %vm241_vm13 = vcmp.eq.s32.totalorder %v239_v31, 0 }
  0x46   :  { %vm240_vm15 = vcmp.lt.s32.totalorder %v239_v31, 2 }
  0x47   :  { %v110_v5 = vclz %v275_v4  ;;  %vm141_vm10 = vcmp.eq.s32.totalorder %v136_v30, 2  ;;  %vm138_vm12 = vcmp.eq.s32.totalorder %v136_v30, 0  ;;  %vm137_vm14 = vcmp.lt.s32.totalorder %v136_v30, 2 }
  0x49   :  { %v276_v6 = vadd.s32 4294967294, %v110_v5 }
  0x4b   :  { %vm277_vm6 = vcmp.lt.s32.totalorder %v276_v6, 0 }
  0x4c   :  { %v113_v9 = vsel %vm277_vm6, 0, %v276_v6 }
  0x4d   :  { %v114_v11 = vsub.s32 32, %v113_v9  ;;  %v115_v12 = vshll.u32 %v106_v2, %v113_v9  ;;  %v118_v13 = vsub.s32 4294967266, %v113_v9 }
  0x4f   :  { %v116_v14 = vshrl.u32 %v98_v8, %v114_v11  ;;  %v119_v15 = vadd.s32 127, %v118_v13 }
  0x51   :  { %v117_v16 = vor.u32 %v116_v14, %v115_v12  ;;  %v120_v17 = vshll.u32 %v119_v15, 23 }
  0x53   :  { %v121_v18 = vor.u32 4788187, %v120_v17  ;;  %v124_v19 = vcvt.s32.f32 %v117_v16 }
  0x55   :  { %v122_v20 = vand.u32 2147483647, %v121_v18 }
  0x57   :  { %v125_v22 = vmul.f32 %v124_v19, %v122_v20 }
  0x59   :  { %v126_v23 = vxor.u32 2147483648, %v125_v22 }
  0x5b   :  { %v127_v25 = vsel %vm44_vm7, %v126_v23, %v125_v22 }
  0x5c   :  { %v130_v26 = vsel %vm43_vm8, %v381_v7, %v127_v25 }
  0x5d   :  { %295 = vcosq.f32 %v130_v26 }
  0x5e   :  { %297 = vsinq.f32 %v130_v26 }
  0x67   :  { %v296_v35 = vpop.eup %295 }
  0x68   :  { %v298_v36 = vpop.eup %297  ;;  %v142_v37 = vxor.u32 2147483648, %v296_v35 }
  0x69   :  { %v139_v38 = vxor.u32 2147483648, %v298_v36 }
  0x6a   :  { %v143_v39 = vsel %vm141_vm10, %v142_v37, %v298_v36  ;;  %v246_v40 = vsel %vm244_vm11, %v142_v37, %v298_v36 }
  0x6b   :  { %v140_v1 = vsel %vm138_vm12, %v296_v35, %v139_v38  ;;  %v243_v41 = vsel %vm241_vm13, %v296_v35, %v139_v38 }
  0x6c   :  { %v144_v42 = vsel %vm137_vm14, %v140_v1, %v143_v39  ;;  %v247_v43 = vsel %vm240_vm15, %v243_v41, %v246_v40 }
  0x6d   :  { %v145_v44 = vsel %vm134_vm0, nan, %v144_v42  ;;  %v248_v45 = vsel %vm134_vm0, nan, %v247_v43 }
  0x6e   :  { %v255_v46 = vsel %vm254_vm1, %v145_v44, %v248_v45 }
  0x6f   :  { %256 = vst [vmem:[#allocation5] sm:$0xff] %v255_v46 }
  0x70   :  { %332 = shalt.err (!%p329_p12)
}
  0x71   :  { %s333_s22 = scalar_lea.hbm %s416_s1, 128 }
  0x72   :  { %p334_p13 = scmp.ne.s32.totalorder %s416_s1, %s333_s22  ;;  %p337_p0 = scmp.lt.u32.totalorder %s333_s22, %s416_s1 }
  0x74   :  { %p339_p1 = pnand %p337_p0, %p334_p13 }
  0x76   :  { %342 = shalt.err (!%p339_p1)
}
  0x77   :  { %266 = dma.vmem_to_hbm [thread:$0]  %s264_s18, 128, %s416_s1, [#allocation4]  }
  0x78   :  { %345 = dma.done.wait [#allocation4], 128  }
  0x79   :  { %346 = vsyncadd [#allocation4], 4294967168 }
  0x7a   :  { %270 = vsyncpa [#allocation3], 1 }
  0x7b   :  { %271 = vsyncpa [#allocation4], 1 }

</bundles_post_ra>
